<compile_context>
chip_gen: v7x
topology: tpu7x:2x2x1
jax: 0.10.0
libtpu: 0.0.40
codegen_flags: <defaults>
</compile_context>

<pallas_src>
import jax
import jax.numpy as jnp
from jax.experimental import pallas as pl
from jax.experimental.pallas import tpu as pltpu

_N_OUT = 6        # BackboneUpdate output channels
_N_PAD = 128      # lane-dense padded weight width (MXU RHS)


def _backbone_update_kernel(s_ref, w_ref, b_ref, o_ref):
    # s_ref: (TM, C_s), w_ref: (C_s, 128), b_ref: (1, 6), o_ref: (TM, 6)
    acc = jnp.dot(s_ref[...], w_ref[...], preferred_element_type=jnp.float32)
    o_ref[...] = (acc[:, :_N_OUT] + b_ref[...].astype(jnp.float32)
                  ).astype(o_ref.dtype)


def _sublane_multiple(dtype) -> int:
    # f32 -> 8, bf16 -> 16, int8/fp8 -> 32 rows per packed sublane group.
    return max(8, 32 // jnp.dtype(dtype).itemsize)


def _round_up(x: int, m: int) -> int:
    return ((x + m - 1) // m) * m


def prepare_backbone_update_params(weight: jax.Array, bias: jax.Array,
                                   dtype) -> tuple[jax.Array, jax.Array]:
    """One-time parameter prep (hoist out of the per-call path).

    weight: [6, C_s] (PyTorch nn.Linear layout), bias: [6].
    Returns (W^T padded to [C_s, 128], bias as [1, 6]), both cast to `dtype`.
    """
    w_t = jnp.pad(weight.T.astype(dtype), ((0, 0), (0, _N_PAD - _N_OUT)))
    b2d = bias.reshape(1, _N_OUT).astype(dtype)
    return w_t, b2d


def backbone_update_prepared(s: jax.Array, w_t: jax.Array, b2d: jax.Array,
                             *, tm: int = 2048) -> jax.Array:
    """Run the kernel with pre-padded/cast parameters.

    Args:
        s:   [*, N_res, C_s] single representation
        w_t: [C_s, 128] padded transposed weight (from prepare_...)
        b2d: [1, 6] bias (from prepare_...)
        tm:  row tile size (sweep 1024-4096)
    Returns:
        [*, N_res, 6] update vector
    """
    orig_shape = s.shape
    c_s = orig_shape[-1]
    m = 1
    for d in orig_shape[:-1]:
        m *= d
    s2d = s.reshape(m, c_s)

    itemsize = jnp.dtype(s.dtype).itemsize
    mult = _sublane_multiple(s.dtype)

    # Row-tile sizing: multiple of the sublane packing; when M is small, cap
    # at ceil(M/2) so the grid has >= 2 steps (megacore sharding on v7x).
    tm_eff = _round_up(tm, mult)
    m_rounded = _round_up(m, mult)
    if m_rounded > mult:
        tm_eff = min(tm_eff, _round_up(pl.cdiv(m, 2), mult))
    else:
        tm_eff = min(tm_eff, m_rounded)

    grid = (pl.cdiv(m, tm_eff),)   # partial last block handled by Pallas

    cost = pl.CostEstimate(
        flops=2 * m * c_s * _N_OUT,
        bytes_accessed=(m * c_s * itemsize          # activation read
                        + m * _N_OUT * itemsize     # output write
                        + c_s * _N_PAD * itemsize   # weight read (once)
                        + _N_OUT * itemsize),       # bias read
        transcendentals=0,
    )

    out = pl.pallas_call(
        _backbone_update_kernel,
        out_shape=jax.ShapeDtypeStruct((m, _N_OUT), s.dtype),
        grid_spec=pltpu.PrefetchScalarGridSpec(
            num_scalar_prefetch=0,
            grid=grid,
            in_specs=[
                pl.BlockSpec((tm_eff, c_s), lambda i: (i, 0)),   # activations
                pl.BlockSpec((c_s, _N_PAD), lambda i: (0, 0)),   # weight (resident)
                pl.BlockSpec((1, _N_OUT), lambda i: (0, 0)),     # bias (resident)
            ],
            out_specs=pl.BlockSpec((tm_eff, _N_OUT), lambda i: (i, 0)),
        ),
        compiler_params=pltpu.CompilerParams(
            dimension_semantics=("parallel",)),
        cost_estimate=cost,
    )(s2d, w_t, b2d)

    return out.reshape(*orig_shape[:-1], _N_OUT)


def backbone_update(s: jax.Array, weight: jax.Array, bias: jax.Array,
                    *, tm: int = 2048) -> jax.Array:
    """Convenience wrapper: prepares params then runs the kernel.

    For repeated calls with the same parameters, call
    prepare_backbone_update_params once and use backbone_update_prepared.
    """
    w_t, b2d = prepare_backbone_update_params(weight, bias, s.dtype)
    return backbone_update_prepared(s, w_t, b2d, tm=tm)


if __name__ == "__main__":
    # Small shapes consistent with the module: batch=2, N_res=16, c_s=32.
    batch, n_res, c_s = 2, 16, 32

    key = jax.random.PRNGKey(0)
    k_s, k_w, k_b = jax.random.split(key, 3)

    s = jax.random.normal(k_s, (batch, n_res, c_s), dtype=jnp.float32)

    # NOTE: the module uses Linear(..., init='final'), which zero-initializes
    # W and b. Zeros would make the kernel output trivially zero, so we use
    # small deterministic random parameters here to exercise the compute path.
    weight = 0.02 * jax.random.normal(k_w, (6, c_s), dtype=jnp.float32)
    bias = 0.02 * jax.random.normal(k_b, (6,), dtype=jnp.float32)

    # Prepare params once (hoisted pad/cast), then run the kernel.
    w_t, b2d = prepare_backbone_update_params(weight, bias, s.dtype)
    out = backbone_update_prepared(s, w_t, b2d)
    out = jax.block_until_ready(out)

    # Reference check (plain JAX) for correctness.
    ref = s @ weight.T + bias
    assert out.shape == (batch, n_res, 6)
    assert jnp.allclose(out, ref, atol=1e-5, rtol=1e-5)

    print("KERNEL_OK")
</pallas_src>

<mosaic_0001>
module attributes {stable_mosaic.version = 11 : i64} {
  func.func @_backbone_update_kernel(%arg0: i32, %arg1: memref<16x32xf32, #tpu.memory_space<vmem>>, %arg2: memref<32x128xf32, #tpu.memory_space<vmem>>, %arg3: memref<1x6xf32, #tpu.memory_space<vmem>>, %arg4: memref<16x6xf32, #tpu.memory_space<vmem>>) attributes {dimension_semantics = [#tpu.dimension_semantics<parallel>], iteration_bounds = array<i64: 2>, scalar_prefetch = 0 : i64, scratch_operands = 0 : i64, tpu.core_type = #tpu.core_type<tc>, window_params = [{transform_indices = @transform_0, window_bounds = array<i64: 16, 32>}, {pipeline_mode = #tpu.pipeline_mode<synchronous>, transform_indices = @transform_1, window_bounds = array<i64: 32, 128>}, {pipeline_mode = #tpu.pipeline_mode<synchronous>, transform_indices = @transform_2, window_bounds = array<i64: 1, 6>}, {transform_indices = @transform_3, window_bounds = array<i64: 16, 6>}]} {
    %c0 = arith.constant 0 : index
    %c0_0 = arith.constant 0 : index
    %0 = vector.load %arg1[%c0, %c0_0] : memref<16x32xf32, #tpu.memory_space<vmem>>, vector<16x32xf32>
    %c0_1 = arith.constant 0 : index
    %c0_2 = arith.constant 0 : index
    %1 = vector.load %arg2[%c0_1, %c0_2] : memref<32x128xf32, #tpu.memory_space<vmem>>, vector<32x128xf32>
    %cst = arith.constant dense<0.000000e+00> : vector<16x128xf32>
    %2 = tpu.matmul %0, %1, %cst {dimension_numbers = #tpu.dot_dimension_numbers<[1], [0], [0], [1], [0, 0, 1, 1], [], []>} : vector<16x32xf32>, vector<32x128xf32>, vector<16x128xf32> -> vector<16x128xf32>
    %3 = vector.extract_strided_slice %2 {offsets = [0, 0], sizes = [16, 6], strides = [1, 1]} : vector<16x128xf32> to vector<16x6xf32>
    %c0_3 = arith.constant 0 : index
    %c0_4 = arith.constant 0 : index
    %4 = vector.load %arg3[%c0_3, %c0_4] : memref<1x6xf32, #tpu.memory_space<vmem>>, vector<1x6xf32>
    %5 = vector.broadcast %4 : vector<1x6xf32> to vector<16x6xf32>
    %6 = arith.addf %3, %5 : vector<16x6xf32>
    %c0_5 = arith.constant 0 : index
    %c0_6 = arith.constant 0 : index
    %7 = vector.load %arg4[%c0_5, %c0_6] : memref<16x6xf32, #tpu.memory_space<vmem>>, vector<16x6xf32>
    tpu.vector_store %arg4[%c0_5, %c0_6], %6 {strides = array<i32>} : memref<16x6xf32, #tpu.memory_space<vmem>>, vector<16x6xf32>,
    return
  }
  func.func @transform_0(%arg0: i32) -> (i32, i32) {
    %c0_i32 = arith.constant 0 : i32
    %c0_i32_0 = arith.constant 0 : i32
    return %arg0, %c0_i32 : i32, i32
  }
  func.func @transform_1(%arg0: i32) -> (i32, i32) {
    %c0_i32 = arith.constant 0 : i32
    %c0_i32_0 = arith.constant 0 : i32
    %c0_i32_1 = arith.constant 0 : i32
    return %c0_i32, %c0_i32_0 : i32, i32
  }
  func.func @transform_2(%arg0: i32) -> (i32, i32) {
    %c0_i32 = arith.constant 0 : i32
    %c0_i32_0 = arith.constant 0 : i32
    %c0_i32_1 = arith.constant 0 : i32
    return %c0_i32, %c0_i32_0 : i32, i32
  }
  func.func @transform_3(%arg0: i32) -> (i32, i32) {
    %c0_i32 = arith.constant 0 : i32
    %c0_i32_0 = arith.constant 0 : i32
    return %arg0, %c0_i32 : i32, i32
  }
}

</mosaic_0001>

<bundles_post_ra>
// kernel: tpu_custom_call.1
= control target key start
LH: loop header
LB: loop body
LE: loop exit
PB: predicated region body
PF: predicated region fallthrough
CT: control target
= control target key end

     0   :  { %8 = vsyncpa [#allocation3], 0  ;;  %s757_s0 = inlined_call_operand.hbm [shape: f32[32,32], index: 0, kind: input, shape index: {}]   ;;  %s758_s1 = inlined_call_operand.hbm [shape: f32[32,128], index: 1, kind: input, shape index: {}]   ;;  %s759_s2 = inlined_call_operand.vmem [shape: f32[1,6], index: 2, kind: input, shape index: {}]   ;;  %s760_s3 = inlined_call_operand.vmem [shape: f32[32,6], index: 3, kind: output, shape index: {}]  }
   0x1   :  { %10 = vsyncpa [#allocation3 + $0x1], 0 }
   0x2   :  { %11 = vsyncpa [#allocation5], 0  ;;  %s603_s12 = smov 0   ;;  %s605_s13 = smov 0  }
   0x3   :  { %s607_s14 = smov 0   ;;  %s609_s15 = smov 0  }
   0x4 LB: > { %s385_s16 = sadd.s32 4294967295, %s577_s15   ;;  %p37_p0 = scmp.ne.s32.totalorder %s569_s13, %s565_s12  ;;  %s577_s15 = sphi %s609_s15, %s776_s15   ;;  %s573_s14 = sphi %s607_s14, %s775_s14   ;;  %s569_s13 = sphi %s605_s13, %s774_s13   ;;  %s565_s12 = sphi %s603_s12, %s773_s12  }
   0x5   : > { %p625_p1 = scmp.eq.s32.totalorder %s385_s16, 0  ;;  %p387_p2 = scmp.ge.s32.totalorder %s577_s15, 1 }
   0x6   : > { %p116_p3 = scmp.lt.s32.totalorder %s577_s15, 3  ;;  %s579_s20 = smov [#allocation4]  }
   0x7   : > { %s765_s17 = scalar_select %p625_p1, 1, 0 }
   0x8   : > { %p633_p4 = por %p625_p1, %p37_p0  ;;  %p637_p5 = pnand %p387_p2, %p116_p3 }
   0x9   : > { %s128_s21 = sshll.u32 %s579_s20, 4  ;;  %s650_s23 = sadd.s32 1, %s577_s15   ;;  %s129_s21 = int_to_ptr.vmem [resolvable:$true] %s128_s21 }
   0xa   : > { %s766_s18 = scalar_select %p633_p4, 1, 0 }
   0xb   : > { %s767_s19 = scalar_select %p637_p5, 1, 0 }
   0xc   : > { %p435_p6 = pneg %p637_p5  ;;  %s24_s24 = sadd.s32 1, %s573_s14 }
   0xd   : > { %s21_s25 = ssub.s32 %s577_s15, %s650_s23  ;;  %s481_s28 = scalar_lea.hbm %s758_s1, 512 }
   0xe   : > { %p645_p7 = pnand %p435_p6, %p625_p1  ;;  %p482_p8 = scmp.ne.s32.totalorder %s758_s1, %s481_s28 }
   0xf   : > { %p488_p12 = scmp.lt.u32.totalorder %s481_s28, %s758_s1 }
  0x10   : > { %p483_p9 = pneg %p645_p7 }
  0x12   : > { %p484_p10 = pnand %p483_p9, %p482_p8 }
  0x14   : > { %p485_p11 = pneg %p484_p10 }
  0x16   : > { %p490_p13 = pnand %p488_p12, %p485_p11 }
  0x18   : > { %493 = shalt.err (!%p490_p13)
}
  0x19   : > { %s494_s6 = scalar_lea.vmem %s129_s21, 512  ;;  %p502_p6 = scmp.lt.s32.totalorder %s129_s21, %s129_s21 }
  0x1a   : > { %p495_p0 = scmp.ne.s32.totalorder %s129_s21, %s494_s6  ;;  %p503_p1 = scmp.lt.s32.totalorder %s494_s6, %s494_s6 }
  0x1c   : > { %p497_p2 = pnand %p495_p0, %p483_p9  ;;  %p504_p4 = por %p503_p1, %p502_p6 }
  0x1e   : > { %p498_p3 = pneg %p497_p2 }
  0x20   : > { %p505_p5 = pnand %p504_p4, %p498_p3 }
  0x22   : > { %508 = shalt.err (!%p505_p5)
}
  0x23   : > { %s580_s7 = smov 128   ;;  %s581_s8 = smov 8  }
  0x24   : > { %438 = dma.hbm_to_vmem [thread:$0]  (!%p645_p7), %s758_s1, 512, %s129_s21, [#allocation5], %s580_s7, %s580_s7, %s581_s8  }
  0x25   : > { %p22_p1 = scmp.eq.s32.totalorder %s21_s25, 0  ;;  %p31_p4 = scmp.ne.s32.totalorder %s573_s14, %s569_s13 }
  0x26   : > { %p32_p5 = scmp.eq.s32.totalorder %s577_s15, 0  ;;  %p444_p8 = scmp.lt.s32.totalorder %s577_s15, 2 }
  0x27   : > { %s679_s11 = scalar_select %p22_p1, %s573_s14, %s24_s24  }
  0x28   : > { %p33_p9 = por %p32_p5, %p31_p4  ;;  %s145_s12 = sand.u32 1, %s573_s14  }
  0x29   : > { %s390_s20 = sshll.u32 %s145_s12, 4  ;;  %s403_s26 = sshll.u32 %s577_s15, 8 }
  0x2a   : > { %s686_s22 = scalar_lea.hbm %s757_s0, %s403_s26  ;;  %s149_s21 = scalar_lea.vmem [#allocation2], %s390_s20 }
  0x2b   : > { %s156_s25 = sshll.u32 %s149_s21, 4  ;;  %p690_p7 = pnand %p444_p8, %p33_p9  ;;  %s688_s25 = int_to_ptr.vmem [resolvable:$true] %s156_s25 }
  0x2c   : > { %s694_s29 = scalar_lea.sflag [#allocation3], %s145_s12  ;;  %s509_s30 = scalar_lea.hbm %s686_s22, 256 }
  0x2d   : > { %p510_p10 = scmp.ne.s32.totalorder %s686_s22, %s509_s30  ;;  %p511_p11 = pneg %p690_p7 }
  0x2e   : > { %s514_s6 = scalar_lea.hbm %s757_s0, 512  ;;  %p515_p0 = scmp.lt.u32.totalorder %s686_s22, %s757_s0 }
  0x2f   : > { %p512_p12 = pnand %p511_p11, %p510_p10  ;;  %p516_p2 = scmp.lt.u32.totalorder %s514_s6, %s509_s30 }
  0x30   : > { %p518_p6 = scmp.lt.u32.totalorder %s509_s30, %s686_s22 }
  0x31   : > { %p513_p13 = pneg %p512_p12  ;;  %p517_p3 = por %p516_p2, %p515_p0 }
  0x33   : > { %p519_p1 = por %p518_p6, %p517_p3 }
  0x35   : > { %p520_p4 = pnand %p519_p1, %p513_p13 }
  0x37   : > { %523 = shalt.err (!%p520_p4)
}
  0x38   : > { %s524_s12 = scalar_lea.vmem %s688_s25, 256  ;;  %s582_s20 = smov [#allocation2]  }
  0x39   : > { %p525_p5 = scmp.ne.s32.totalorder %s688_s25, %s524_s12  ;;  %s529_s26 = sshll.u32 %s582_s20, 4  ;;  %s530_s26 = int_to_ptr.vmem [resolvable:$false] %s529_s26 }
  0x3a   : > { %s531_s27 = scalar_lea.vmem %s530_s26, 512  ;;  %p532_p10 = scmp.lt.s32.totalorder %s688_s25, %s530_s26 }
  0x3b   : > { %p527_p8 = pnand %p525_p5, %p511_p11  ;;  %p533_p12 = scmp.lt.s32.totalorder %s531_s27, %s524_s12 }
  0x3d   : > { %p528_p9 = pneg %p527_p8  ;;  %p534_p0 = por %p533_p12, %p532_p10 }
  0x3f   : > { %p535_p2 = pnand %p534_p0, %p528_p9 }
  0x41   : > { %538 = shalt.err (!%p535_p2)
}
  0x42   : > { %442 = dma.hbm_to_vmem [thread:$0]  (!%p690_p7), %s686_s22, 256, %s688_s25, %s694_s29, %s580_s7, %s580_s7, %s581_s8  }
  0x43   : > { %p770_p11 = scmp.ne.s32.totalorder %s767_s19, 0 }
  0x44   : > { %s170_s28 = sand.u32 (!%p770_p11), 1, %s569_s13   ;;  %p771_p13 = scmp.ne.s32.totalorder (!%p770_p11), %s766_s18, 0 }
  0x45   : > { %168 = sbr.rel (%p770_p11) target bundleno = 307 (0x133), region = 32  ;;  %s394_s21 = sshll.u32 (!%p770_p11), %s170_s28, 4 }
  0x46   : > { %s171_s30 = scalar_lea.sflag (!%p770_p11), [#allocation3], %s170_s28  ;;  %s174_s4 = scalar_lea.vmem (!%p770_p11), [#allocation2], %s394_s21 }
  0x4c   : > { %556 = dma.done.wait (%p771_p13), %s171_s30, 256  }
  0x4d   : > { %558 = vsyncadd (%p771_p13), %s171_s30, 4294967040  ;;  %p772_p3 = scmp.ne.s32.totalorder %s765_s17, 0 }
  0x4f   : > { %560 = dma.done.wait (%p772_p3), [#allocation5], 512  }
  0x50   : > { %562 = vsyncadd (%p772_p3), [#allocation5], 4294966784  ;;  %vm214_vm0 = vcmask 261120   ;;  %v210_v0 = vld [vmem:[#allocation4] sm:$0xff]  ;;  %v211_v1 = vld [vmem:[#allocation4 + $0x8] sm:$0xff]  ;;  %s396_s18 = sshll.u32 %s385_s16, 1 }
  0x51   : > { %v212_v2 = vld [vmem:[#allocation4 + $0x10] sm:$0xff]  ;;  %v421_v3 = vpack.c.bf16 %v211_v1, %v210_v0  ;;  %v213_v4 = vld [vmem:[#allocation4 + $0x18] sm:$0xff]  ;;  %p203_p7 = scmp.lt.s32.totalorder %s396_s18, 3  ;;  %v400_v8 = vld [vmem:[%s759_s2] ss:$0 sm:$0xff]  ;;  %vm305_vm1 = vcmask 48128  }
  0x52   : > { %v208_v5 = vld [vmem:[%s174_s4] sm:$0xff]  ;;  %v425_v6 = vpack.c.bf16 %v213_v4, %v212_v2  ;;  %v209_v7 = vld [vmem:[%s174_s4 + $0x8] sm:$0xff] }
  0x53   : > { %418 = vmatprep.mubr.msk.f32.mxu0 %vm214_vm0, %v208_v5  ;;  %422 = vmatprep.subr.bf16.mxu0 %v421_v3  ;;  %s778_s18 = smov (!%p203_p7, %s396_s18), 3 }
  0x54   : > { %424 = vmatpush3.bf16.msra.mxu0 %v421_v3  ;;  %s397_s17 = sshll.u32 %s778_s18, 3 }
  0x55   : > { %426 = vmatprep.subr.bf16.mxu0 %v425_v6  ;;  %s206_s25 = scalar_lea.vmem %s760_s3, %s397_s17 }
  0x58   : > { %428 = vmatpush3.bf16.msra.mxu0 %v425_v6 }
  0x5b   : > { %419 = vmatmul.mubr.msk.f32.vlgmr.msra.gmra.mrb[0].mxu0 %vm214_vm0, %v209_v7 }
 0x12e   : > { %v420_v9 = vpop.f32.mrb[0].mxu0 }
 0x12f   : > { %v287_v10 = vpop.f32.mrb[1].mxu0  ;;  %v304_v12 = vadd.f32 %v420_v9, %v400_v8 }
 0x130   : > { %v303_v11 = vadd.f32 %v400_v8, %v287_v10 }
 0x131   : > { %307 = vst.msk [vmem:[%s206_s25 + $0x8] sm:$0xff] %vm305_vm1, %v304_v12 }
 0x132   : > { %306 = vst.msk [vmem:[%s206_s25] sm:$0xff] %vm305_vm1, %v303_v11 }
 0x133 PF: > { %p14_p6 = scmp.ge.s32.totalorder %s650_s23, 4   ;;  %s773_s12 = smov %s569_s13 }
 0x134   : > { %s774_s13 = smov %s573_s14  ;;  %s775_s14 = smov %s679_s11 }
 0x135   : > { %s776_s15 = smov %s650_s23  ;;  %16 = sbr.rel (!%p14_p6) target bundleno = 4 (0x4), region = 76 }
 0x13c   :  { %330 = vsyncpa [#allocation3], 1 }
 0x13d   :  { %332 = vsyncpa [#allocation3 + $0x1], 1 }
 0x13e   :  { %333 = vsyncpa [#allocation5], 1 }

</bundles_post_ra>
